<compile_context>
chip_gen: v6e
topology: v6e:2x2x1
jax: 0.10.0
libtpu: 0.0.40
codegen_flags: <defaults>
</compile_context>

<pallas_src>
import jax
import jax.numpy as jnp
from jax.experimental import pallas as pl
from jax.experimental.pallas import tpu as pltpu


def _round_up(x, m):
    return (x + m - 1) // m * m


def _seq_encoder_kernel(x_ref, w_ref, b_ref, o_ref):
    """o = x @ w + b.  K-tiled; f32 accumulation directly into the resident
    output block (out_spec index is constant across the K axis)."""
    k = pl.program_id(1)

    @pl.when(k == 0)
    def _():
        o_ref[...] = jnp.zeros_like(o_ref)

    o_ref[...] += jnp.dot(
        x_ref[...], w_ref[...], preferred_element_type=jnp.float32
    )

    @pl.when(k == pl.num_programs(1) - 1)
    def _():
        o_ref[...] += b_ref[...]


def seq_wrapper_forward(imgs, acts, weight, bias, *, tm=256, tk=1024):
    """JAX/Pallas equivalent of SeqWrapper.forward.

    imgs   : (B, T, C, H, W) float32
    acts   : unused (signature parity with the PyTorch module)
    weight : (D, hidden) where D = C*H*W
    bias   : (hidden,)
    returns (B, T, hidden) float32
    """
    del acts  # SeqWrapper.forward never touches acts
    B, T = imgs.shape[0], imgs.shape[1]
    x = imgs.reshape(B * T, -1)      # imgs.view(-1, *imgs.shape[2:]) + flatten
    N, D = x.shape
    hidden = weight.shape[1]

    # TPU-friendly padded tiling: rows -> multiple of tm (>=8), K -> multiple
    # of tk (>=128), output columns -> multiple of 128 (lane-dense stores).
    tm_eff = min(tm, _round_up(N, 8))
    tk_eff = min(tk, _round_up(D, 128))
    n_pad = _round_up(N, tm_eff)
    d_pad = _round_up(D, tk_eff)
    h_pad = _round_up(hidden, 128)

    # bf16 inputs for the MXU fast path; zero padding does not change results.
    x_p = jnp.pad(x.astype(jnp.bfloat16), ((0, n_pad - N), (0, d_pad - D)))
    w_p = jnp.pad(weight.astype(jnp.bfloat16),
                  ((0, d_pad - D), (0, h_pad - hidden)))
    b_p = jnp.pad(bias.astype(jnp.float32), (0, h_pad - hidden)).reshape(1, h_pad)

    grid = (n_pad // tm_eff, d_pad // tk_eff)   # (rows parallel, K reduction last)

    cost = pl.CostEstimate(
        flops=2 * n_pad * d_pad * h_pad,
        transcendentals=0,
        bytes_accessed=(x_p.size * 2 + w_p.size * 2
                        + n_pad * h_pad * 4 + h_pad * 4),
    )

    out = pl.pallas_call(
        _seq_encoder_kernel,
        out_shape=jax.ShapeDtypeStruct((n_pad, h_pad), jnp.float32),
        grid_spec=pltpu.PrefetchScalarGridSpec(
            num_scalar_prefetch=0,
            grid=grid,
            in_specs=[
                pl.BlockSpec((tm_eff, tk_eff), lambda i, k: (i, k)),   # x tile
                pl.BlockSpec((tk_eff, h_pad), lambda i, k: (k, 0)),    # w tile
                pl.BlockSpec((1, h_pad), lambda i, k: (0, 0)),         # bias
            ],
            out_specs=pl.BlockSpec((tm_eff, h_pad), lambda i, k: (i, 0)),
        ),
        compiler_params=pltpu.CompilerParams(
            dimension_semantics=("parallel", "arbitrary"),
        ),
        cost_estimate=cost,
    )(x_p, w_p, b_p)

    # Slice away the padding, then unfold back to (B, T, hidden).
    return out[:N, :hidden].reshape(B, T, hidden)


if __name__ == "__main__":
    # Small, deterministic shapes: batch=2, seq=8, channels=4, spatial=16x16,
    # hidden=32  ->  D = 4*16*16 = 1024.
    B, T, C, H, W = 2, 8, 4, 16, 16
    HIDDEN = 32
    D = C * H * W

    key = jax.random.PRNGKey(0)
    k_img, k_act, k_w, k_b = jax.random.split(key, 4)

    imgs = jax.random.normal(k_img, (B, T, C, H, W), dtype=jnp.float32)
    acts = jax.random.normal(k_act, (B, T, 6), dtype=jnp.float32)  # unused
    weight = jax.random.normal(k_w, (D, HIDDEN), dtype=jnp.float32) * 0.02
    bias = jax.random.normal(k_b, (HIDDEN,), dtype=jnp.float32) * 0.01

    out = seq_wrapper_forward(imgs, acts, weight, bias)
    out = jax.block_until_ready(out)

    # Correctness: exact-precision reference (bf16 inputs, f32 accumulation)
    # plus a loose check against the full-f32 forward for semantic fidelity.
    x_flat = imgs.reshape(B * T, -1)
    ref_bf16 = (
        jnp.dot(x_flat.astype(jnp.bfloat16), weight.astype(jnp.bfloat16),
                preferred_element_type=jnp.float32) + bias
    ).reshape(B, T, HIDDEN)
    ref_f32 = (x_flat @ weight + bias).reshape(B, T, HIDDEN)

    assert out.shape == (B, T, HIDDEN), out.shape
    assert jnp.allclose(out, ref_bf16, atol=2e-3, rtol=2e-3)
    assert jnp.allclose(out, ref_f32, atol=5e-2, rtol=5e-2)

    print("KERNEL_OK")
</pallas_src>

<mosaic_0001>
module attributes {stable_mosaic.version = 11 : i64} {
  func.func @_seq_encoder_kernel(%arg0: i32, %arg1: i32, %arg2: memref<16x1024xbf16, #tpu.memory_space<vmem>>, %arg3: memref<1024x128xbf16, #tpu.memory_space<vmem>>, %arg4: memref<1x128xf32, #tpu.memory_space<vmem>>, %arg5: memref<16x128xf32, #tpu.memory_space<vmem>>) attributes {dimension_semantics = [#tpu.dimension_semantics<parallel>, #tpu.dimension_semantics<arbitrary>], iteration_bounds = array<i64: 1, 1>, scalar_prefetch = 0 : i64, scratch_operands = 0 : i64, tpu.core_type = #tpu.core_type<tc>, window_params = [{transform_indices = @transform_0, window_bounds = array<i64: 16, 1024>}, {transform_indices = @transform_1, window_bounds = array<i64: 1024, 128>}, {pipeline_mode = #tpu.pipeline_mode<synchronous>, transform_indices = @transform_2, window_bounds = array<i64: 1, 128>}, {transform_indices = @transform_3, window_bounds = array<i64: 16, 128>}]} {
    %c0_i32 = arith.constant 0 : i32
    %0 = arith.cmpi eq, %arg1, %c0_i32 : i32
    %1 = arith.extui %0 : i1 to i32
    %c0_i32_0 = arith.constant 0 : i32
    %2 = arith.cmpi ne, %1, %c0_i32_0 : i32
    scf.if %2 {
      %cst_10 = arith.constant 0.000000e+00 : f32
      %12 = vector.broadcast %cst_10 : f32 to vector<16x128xf32>
      %c0_11 = arith.constant 0 : index
      %c0_12 = arith.constant 0 : index
      %13 = vector.load %arg5[%c0_11, %c0_12] : memref<16x128xf32, #tpu.memory_space<vmem>>, vector<16x128xf32>
      tpu.vector_store %arg5[%c0_11, %c0_12], %12 {strides = array<i32>} : memref<16x128xf32, #tpu.memory_space<vmem>>, vector<16x128xf32>,
    } else {
    }
    %c0 = arith.constant 0 : index
    %c0_1 = arith.constant 0 : index
    %3 = vector.load %arg5[%c0, %c0_1] : memref<16x128xf32, #tpu.memory_space<vmem>>, vector<16x128xf32>
    %c0_2 = arith.constant 0 : index
    %c0_3 = arith.constant 0 : index
    %4 = vector.load %arg2[%c0_2, %c0_3] : memref<16x1024xbf16, #tpu.memory_space<vmem>>, vector<16x1024xbf16>
    %c0_4 = arith.constant 0 : index
    %c0_5 = arith.constant 0 : index
    %5 = vector.load %arg3[%c0_4, %c0_5] : memref<1024x128xbf16, #tpu.memory_space<vmem>>, vector<1024x128xbf16>
    %cst = arith.constant dense<0.000000e+00> : vector<16x128xf32>
    %6 = tpu.matmul %4, %5, %cst {dimension_numbers = #tpu.dot_dimension_numbers<[1], [0], [0], [1], [0, 0, 1, 1], [], []>} : vector<16x1024xbf16>, vector<1024x128xbf16>, vector<16x128xf32> -> vector<16x128xf32>
    %7 = arith.addf %3, %6 : vector<16x128xf32>
    %c0_6 = arith.constant 0 : index
    %c0_7 = arith.constant 0 : index
    %8 = vector.load %arg5[%c0_6, %c0_7] : memref<16x128xf32, #tpu.memory_space<vmem>>, vector<16x128xf32>
    tpu.vector_store %arg5[%c0_6, %c0_7], %7 {strides = array<i32>} : memref<16x128xf32, #tpu.memory_space<vmem>>, vector<16x128xf32>,
    %c0_i32_8 = arith.constant 0 : i32
    %9 = arith.cmpi eq, %arg1, %c0_i32_8 : i32
    %10 = arith.extui %9 : i1 to i32
    %c0_i32_9 = arith.constant 0 : i32
    %11 = arith.cmpi ne, %10, %c0_i32_9 : i32
    scf.if %11 {
      %c0_10 = arith.constant 0 : index
      %c0_11 = arith.constant 0 : index
      %12 = vector.load %arg5[%c0_10, %c0_11] : memref<16x128xf32, #tpu.memory_space<vmem>>, vector<16x128xf32>
      %c0_12 = arith.constant 0 : index
      %c0_13 = arith.constant 0 : index
      %13 = vector.load %arg4[%c0_12, %c0_13] : memref<1x128xf32, #tpu.memory_space<vmem>>, vector<1x128xf32>
      %14 = vector.broadcast %13 : vector<1x128xf32> to vector<16x128xf32>
      %15 = arith.addf %12, %14 : vector<16x128xf32>
      %c0_14 = arith.constant 0 : index
      %c0_15 = arith.constant 0 : index
      %16 = vector.load %arg5[%c0_14, %c0_15] : memref<16x128xf32, #tpu.memory_space<vmem>>, vector<16x128xf32>
      tpu.vector_store %arg5[%c0_14, %c0_15], %15 {strides = array<i32>} : memref<16x128xf32, #tpu.memory_space<vmem>>, vector<16x128xf32>,
    } else {
    }
    return
  }
  func.func @transform_0(%arg0: i32, %arg1: i32) -> (i32, i32) {
    %c0_i32 = arith.constant 0 : i32
    return %arg0, %arg1 : i32, i32
  }
  func.func @transform_1(%arg0: i32, %arg1: i32) -> (i32, i32) {
    %c0_i32 = arith.constant 0 : i32
    %c0_i32_0 = arith.constant 0 : i32
    return %arg1, %c0_i32 : i32, i32
  }
  func.func @transform_2(%arg0: i32, %arg1: i32) -> (i32, i32) {
    %c0_i32 = arith.constant 0 : i32
    %c0_i32_0 = arith.constant 0 : i32
    %c0_i32_1 = arith.constant 0 : i32
    return %c0_i32, %c0_i32_0 : i32, i32
  }
  func.func @transform_3(%arg0: i32, %arg1: i32) -> (i32, i32) {
    %c0_i32 = arith.constant 0 : i32
    %c0_i32_0 = arith.constant 0 : i32
    return %arg0, %c0_i32 : i32, i32
  }
}

</mosaic_0001>

<bundles_post_ra>
// kernel: tpu_custom_call.1
= control target key start
LH: loop header
LB: loop body
LE: loop exit
PB: predicated region body
PF: predicated region fallthrough
CT: control target
= control target key end

     0   :  { %8 = vsyncpa [#allocation3], 0  ;;  %s1156_s0 = inlined_call_operand.hbm [shape: bf16[16,1024], index: 0, kind: input, shape index: {}]   ;;  %s1157_s1 = inlined_call_operand.hbm [shape: bf16[1024,128], index: 1, kind: input, shape index: {}]   ;;  %s1158_s2 = inlined_call_operand.vmem [shape: f32[1,128], index: 2, kind: input, shape index: {}]   ;;  %s1159_s3 = inlined_call_operand.hbm [shape: f32[16,128], index: 3, kind: output, shape index: {}]  }
   0x1   :  { %9 = vsyncpa [#allocation6], 0 }
   0x2   :  { %10 = vsyncpa [#allocation4], 0  ;;  %s1115_s12 = smov [#allocation2]  }
   0x3   :  { %s16_s13 = sshll.u32 %s1115_s12, 4  ;;  %s17_s13 = int_to_ptr.vmem [resolvable:$true] %s16_s13 }
   0x4   :  { %s1057_s14 = scalar_lea.vmem %s17_s13, 1024  ;;  %p1062_p1 = scmp.lt.s32.totalorder %s17_s13, %s17_s13 }
   0x5   :  { %p1058_p0 = scmp.ne.s32.totalorder %s17_s13, %s1057_s14  ;;  %p1063_p2 = scmp.lt.s32.totalorder %s1057_s14, %s1057_s14 }
   0x7   :  { %p1064_p3 = por %p1063_p2, %p1062_p1 }
   0x9   :  { %p1065_p4 = pnand %p1064_p3, %p1058_p0 }
   0xb   :  { %1068 = shalt.err (!%p1065_p4)
}
   0xc   :  { %s1116_s15 = smov 512   ;;  %s1117_s16 = smov 32  }
   0xd   :  { %22 = dma.hbm_to_vmem [thread:$0]  %s1156_s0, 1024, %s17_s13, [#allocation3], %s1116_s15, %s1116_s15, %s1117_s16  }
   0xe   :  { %s1118_s19 = smov [#allocation5]  }
   0xf   :  { %s28_s20 = sshll.u32 %s1118_s19, 4  ;;  %s29_s20 = int_to_ptr.vmem [resolvable:$true] %s28_s20 }
  0x10   :  { %s1077_s21 = scalar_lea.vmem %s29_s20, 8192  ;;  %p1082_p6 = scmp.lt.s32.totalorder %s29_s20, %s29_s20 }
  0x11   :  { %p1078_p5 = scmp.ne.s32.totalorder %s29_s20, %s1077_s21  ;;  %p1083_p7 = scmp.lt.s32.totalorder %s1077_s21, %s1077_s21 }
  0x13   :  { %p1084_p8 = por %p1083_p7, %p1082_p6 }
  0x15   :  { %p1085_p9 = pnand %p1084_p8, %p1078_p5 }
  0x17   :  { %1088 = shalt.err (!%p1085_p9)
}
  0x18   :  { %s1119_s22 = smov 64   ;;  %s1120_s23 = smov 4  }
  0x19   :  { %34 = dma.hbm_to_vmem [thread:$0]  %s1157_s1, 8192, %s29_s20, [#allocation6], %s1119_s22, %s1119_s22, %s1120_s23  }
  0x1a   :  { %1109 = dma.done.wait [#allocation3], 1024  }
  0x1b   :  { %1110 = vsyncadd [#allocation3], 4294966272 }
  0x1c   :  { %1111 = dma.done.wait [#allocation6], 8192  }
  0x1d   :  { %1112 = vsyncadd [#allocation6], 4294959104  ;;  %v985_v0 = vld [vmem:[#allocation5 + $0x78] sm:$0xff]   ;;  %v989_v4 = vld [vmem:[#allocation5 + $0x70] sm:$0xff]   ;;  %s1121_s26 = smov [#allocation7]  }
  0x1e   :  { %v986_v1 = vld [vmem:[#allocation5 + $0xf8] sm:$0xff]   ;;  %887 = vmatprep.subr.bf16.mxu0 %v985_v0  ;;  %v990_v5 = vld [vmem:[#allocation5 + $0xf0] sm:$0xff]   ;;  %v993_v8 = vld [vmem:[#allocation5 + $0x68] sm:$0xff]   ;;  %s801_s27 = sshll.u32 %s1121_s26, 4  ;;  %s802_s27 = int_to_ptr.vmem [resolvable:$true] %s801_s27 }
  0x1f   :  { %v987_v2 = vld [vmem:[#allocation5 + $0x38] sm:$0xff]   ;;  %909 = vmatprep.subr.bf16.mxu1 %v986_v1  ;;  %v991_v6 = vld [vmem:[#allocation5 + $0x30] sm:$0xff]   ;;  %v994_v9 = vld [vmem:[#allocation5 + $0xe8] sm:$0xff]   ;;  %s1089_s28 = scalar_lea.vmem %s802_s27, 256  ;;  %p1094_p11 = scmp.lt.s32.totalorder %s802_s27, %s802_s27 }
  0x20   :  { %v988_v3 = vld [vmem:[#allocation5 + $0xb8] sm:$0xff]   ;;  %888 = vmatpush3.bf16.msra.mxu0 %v987_v2  ;;  %v992_v7 = vld [vmem:[#allocation5 + $0xb0] sm:$0xff]   ;;  %v995_v10 = vld [vmem:[#allocation5 + $0x28] sm:$0xff]   ;;  %p1090_p10 = scmp.ne.s32.totalorder %s802_s27, %s1089_s28  ;;  %p1095_p12 = scmp.lt.s32.totalorder %s1089_s28, %s1089_s28 }
  0x21   :  { %910 = vmatpush3.bf16.msra.mxu1 %v988_v3  ;;  %889 = vmatprep.subr.bf16.mxu0 %v989_v4  ;;  %v996_v11 = vld [vmem:[#allocation5 + $0xa8] sm:$0xff]   ;;  %v997_v12 = vld [vmem:[#allocation5 + $0x60] sm:$0xff]   ;;  %v1001_v16 = vld [vmem:[#allocation5 + $0x58] sm:$0xff]  }
  0x22   :  { %911 = vmatprep.subr.bf16.mxu1 %v990_v5  ;;  %v998_v13 = vld [vmem:[#allocation5 + $0xe0] sm:$0xff]   ;;  %v1002_v17 = vld [vmem:[#allocation5 + $0xd8] sm:$0xff]   ;;  %v1005_v20 = vld [vmem:[#allocation5 + $0x50] sm:$0xff]   ;;  %p1096_p13 = por %p1095_p12, %p1094_p11 }
  0x23   :  { %v999_v14 = vld [vmem:[#allocation5 + $0x20] sm:$0xff]   ;;  %v1003_v18 = vld [vmem:[#allocation5 + $0x18] sm:$0xff]   ;;  %v1006_v21 = vld [vmem:[#allocation5 + $0xd0] sm:$0xff]  }
  0x24   :  { %890 = vmatpush3.bf16.msra.mxu0 %v991_v6  ;;  %v1000_v15 = vld [vmem:[#allocation5 + $0xa0] sm:$0xff]   ;;  %v1004_v19 = vld [vmem:[#allocation5 + $0x98] sm:$0xff]   ;;  %v1007_v22 = vld [vmem:[#allocation5 + $0x10] sm:$0xff]   ;;  %p1097_p0 = pnand %p1096_p13, %p1090_p10 }
  0x25   :  { %912 = vmatpush3.bf16.msra.mxu1 %v992_v7  ;;  %891 = vmatprep.subr.bf16.mxu0 %v993_v8  ;;  %v1008_v23 = vld [vmem:[#allocation5 + $0x90] sm:$0xff]   ;;  %v1009_v24 = vld [vmem:[#allocation5 + $0x48] sm:$0xff]   ;;  %v1013_v28 = vld [vmem:[#allocation5 + $0x40] sm:$0xff]  }
  0x26   :  { %913 = vmatprep.subr.bf16.mxu1 %v994_v9  ;;  %v1010_v25 = vld [vmem:[#allocation5 + $0xc8] sm:$0xff]   ;;  %v1014_v29 = vld [vmem:[#allocation5 + $0xc0] sm:$0xff]   ;;  %v1017_v40 = vld [vmem:[#allocation5 + $0x178] sm:$0xff]  }
  0x27   :  { %v1011_v26 = vld [vmem:[#allocation5 + $0x8] sm:$0xff]   ;;  %v1015_v30 = vld [vmem:[#allocation5] sm:$0xff]   ;;  %v1018_v41 = vld [vmem:[#allocation5 + $0x1f8] sm:$0xff]  }
  0x28   :  { %892 = vmatpush3.bf16.msra.mxu0 %v995_v10  ;;  %v1012_v27 = vld [vmem:[#allocation5 + $0x88] sm:$0xff]   ;;  %v1016_v31 = vld [vmem:[#allocation5 + $0x80] sm:$0xff]   ;;  %v1019_v42 = vld [vmem:[#allocation5 + $0x138] sm:$0xff]  }
  0x29   :  { %914 = vmatpush3.bf16.msra.mxu1 %v996_v11  ;;  %893 = vmatprep.subr.bf16.mxu0 %v997_v12  ;;  %v52_v32 = vld [vmem:[#allocation2] sm:$0xff]  ;;  %v53_v34 = vld [vmem:[#allocation2 + $0x8] sm:$0xff]  ;;  %v1020_v43 = vld [vmem:[#allocation5 + $0x1b8] sm:$0xff]  }
  0x2a   :  { %915 = vmatprep.subr.bf16.mxu1 %v998_v13  ;;  %v56_v33 = vld [vmem:[#allocation2 + $0x20] sm:$0xff]  ;;  %v57_v37 = vld [vmem:[#allocation2 + $0x28] sm:$0xff]  ;;  %v1021_v44 = vld [vmem:[#allocation5 + $0x170] sm:$0xff]  }
  0x2b   :  { %v814_v35 = vcombine.low %v52_v32, %v56_v33  ;;  %v815_v36 = vcombine.high %v52_v32, %v56_v33  ;;  %v816_v38 = vcombine.low %v53_v34, %v57_v37  ;;  %v817_v39 = vcombine.high %v53_v34, %v57_v37  ;;  %v1022_v45 = vld [vmem:[#allocation5 + $0x1f0] sm:$0xff]   ;;  %v1025_v48 = vld [vmem:[#allocation5 + $0x168] sm:$0xff]   ;;  %v1029_v52 = vld [vmem:[#allocation5 + $0x160] sm:$0xff]  }
  0x2c   :  { %894 = vmatpush3.bf16.msra.mxu0 %v999_v14  ;;  %v1023_v46 = vld [vmem:[#allocation5 + $0x130] sm:$0xff]   ;;  %v1026_v49 = vld [vmem:[#allocation5 + $0x1e8] sm:$0xff]   ;;  %v1030_v53 = vld [vmem:[#allocation5 + $0x1e0] sm:$0xff]  }
  0x2d   :  { %916 = vmatpush3.bf16.msra.mxu1 %v1000_v15  ;;  %895 = vmatprep.subr.bf16.mxu0 %v1001_v16  ;;  %v1024_v47 = vld [vmem:[#allocation5 + $0x1b0] sm:$0xff]   ;;  %v1027_v50 = vld [vmem:[#allocation5 + $0x128] sm:$0xff]   ;;  %v1031_v54 = vld [vmem:[#allocation5 + $0x120] sm:$0xff]  }
  0x2e   :  { %917 = vmatprep.subr.bf16.mxu1 %v1002_v17  ;;  %644 = vmatprep.mubr.bf16.mxu0 %v815_v36  ;;  %v1028_v51 = vld [vmem:[#allocation5 + $0x1a8] sm:$0xff]   ;;  %v1032_v55 = vld [vmem:[#allocation5 + $0x1a0] sm:$0xff]   ;;  %v1033_v56 = vld [vmem:[#allocation5 + $0x158] sm:$0xff]  }
  0x2f   :  { %685 = vmatprep.mubr.bf16.mxu1 %v817_v39  ;;  %v1034_v57 = vld [vmem:[#allocation5 + $0x1d8] sm:$0xff]   ;;  %v1037_v60 = vld [vmem:[#allocation5 + $0x150] sm:$0xff]   ;;  %v1041_v0 = vld [vmem:[#allocation5 + $0x148] sm:$0xff]  }
  0x30   :  { %896 = vmatpush3.bf16.msra.mxu0 %v1003_v18  ;;  %v1035_v58 = vld [vmem:[#allocation5 + $0x118] sm:$0xff]   ;;  %v1038_v61 = vld [vmem:[#allocation5 + $0x1d0] sm:$0xff]   ;;  %v1042_v1 = vld [vmem:[#allocation5 + $0x1c8] sm:$0xff]  }
  0x31   :  { %918 = vmatpush3.bf16.msra.mxu1 %v1004_v19  ;;  %897 = vmatprep.subr.bf16.mxu0 %v1005_v20  ;;  %v1036_v59 = vld [vmem:[#allocation5 + $0x198] sm:$0xff]   ;;  %v1039_v62 = vld [vmem:[#allocation5 + $0x110] sm:$0xff]   ;;  %v1043_v2 = vld [vmem:[#allocation5 + $0x108] sm:$0xff]  }
  0x32   :  { %919 = vmatprep.subr.bf16.mxu1 %v1006_v21  ;;  %v1040_v63 = vld [vmem:[#allocation5 + $0x190] sm:$0xff]   ;;  %v1044_v3 = vld [vmem:[#allocation5 + $0x188] sm:$0xff]   ;;  %v1045_v4 = vld [vmem:[#allocation5 + $0x140] sm:$0xff]  }
  0x33   :  { %v1046_v5 = vld [vmem:[#allocation5 + $0x1c0] sm:$0xff]   ;;  %v54_v8 = vld [vmem:[#allocation2 + $0x10] sm:$0xff]  ;;  %v55_v12 = vld [vmem:[#allocation2 + $0x18] sm:$0xff] }
  0x34   :  { %898 = vmatpush3.bf16.msra.mxu0 %v1007_v22  ;;  %v1047_v6 = vld [vmem:[#allocation5 + $0x100] sm:$0xff]   ;;  %v58_v9 = vld [vmem:[#allocation2 + $0x30] sm:$0xff]  ;;  %v59_v13 = vld [vmem:[#allocation2 + $0x38] sm:$0xff] }
  0x35   :  { %920 = vmatpush3.bf16.msra.mxu1 %v1008_v23  ;;  %899 = vmatprep.subr.bf16.mxu0 %v1009_v24  ;;  %v1048_v7 = vld [vmem:[#allocation5 + $0x180] sm:$0xff]   ;;  %v818_v10 = vcombine.low %v54_v8, %v58_v9  ;;  %v819_v11 = vcombine.high %v54_v8, %v58_v9  ;;  %v820_v14 = vcombine.low %v55_v12, %v59_v13 }
  0x36   :  { %921 = vmatprep.subr.bf16.mxu1 %v1010_v25  ;;  %v821_v15 = vcombine.high %v55_v12, %v59_v13 }
  0x38   :  { %900 = vmatpush3.bf16.msra.mxu0 %v1011_v26 }
  0x39   :  { %922 = vmatpush3.bf16.msra.mxu1 %v1012_v27  ;;  %901 = vmatprep.subr.bf16.mxu0 %v1013_v28 }
  0x3a   :  { %923 = vmatprep.subr.bf16.mxu1 %v1014_v29 }
  0x3c   :  { %902 = vmatpush3.bf16.msra.mxu0 %v1015_v30 }
  0x3d   :  { %924 = vmatpush3.bf16.msra.mxu1 %v1016_v31  ;;  %931 = vmatprep.subr.bf16.mxu0 %v1017_v40 }
  0x3e   :  { %953 = vmatprep.subr.bf16.mxu1 %v1018_v41 }
  0x3f   :  { %645 = vmatmul.mubr.bf16.vlgmr.msra.gmra.mxu0 %v814_v35 }
  0x40   :  { %686 = vmatmul.mubr.bf16.vlgmr.msra.gmra.mxu1 %v816_v38  ;;  %932 = vmatpush3.bf16.msra.mxu0 %v1019_v42 }
  0x41   :  { %954 = vmatpush3.bf16.msra.mxu1 %v1020_v43  ;;  %933 = vmatprep.subr.bf16.mxu0 %v1021_v44  ;;  %v886_v43 = vld [vmem:[%s1158_s2] ss:$0 sm:$0xff] }
  0x42   :  { %955 = vmatprep.subr.bf16.mxu1 %v1022_v45  ;;  %726 = vmatprep.mubr.bf16.mxu0 %v819_v11 }
  0x43   :  { %767 = vmatprep.mubr.bf16.mxu1 %v821_v15 }
  0x44   :  { %934 = vmatpush3.bf16.msra.mxu0 %v1023_v46 }
  0x45   :  { %956 = vmatpush3.bf16.msra.mxu1 %v1024_v47  ;;  %935 = vmatprep.subr.bf16.mxu0 %v1025_v48 }
  0x46   :  { %957 = vmatprep.subr.bf16.mxu1 %v1026_v49 }
  0x48   :  { %936 = vmatpush3.bf16.msra.mxu0 %v1027_v50 }
  0x49   :  { %958 = vmatpush3.bf16.msra.mxu1 %v1028_v51  ;;  %937 = vmatprep.subr.bf16.mxu0 %v1029_v52 }
  0x4a   :  { %959 = vmatprep.subr.bf16.mxu1 %v1030_v53 }
  0x4c   :  { %938 = vmatpush3.bf16.msra.mxu0 %v1031_v54 }
  0x4d   :  { %960 = vmatpush3.bf16.msra.mxu1 %v1032_v55  ;;  %939 = vmatprep.subr.bf16.mxu0 %v1033_v56 }
  0x4e   :  { %961 = vmatprep.subr.bf16.mxu1 %v1034_v57 }
  0x50   :  { %940 = vmatpush3.bf16.msra.mxu0 %v1035_v58 }
  0x51   :  { %962 = vmatpush3.bf16.msra.mxu1 %v1036_v59  ;;  %941 = vmatprep.subr.bf16.mxu0 %v1037_v60 }
  0x52   :  { %963 = vmatprep.subr.bf16.mxu1 %v1038_v61 }
  0x54   :  { %942 = vmatpush3.bf16.msra.mxu0 %v1039_v62 }
  0x55   :  { %964 = vmatpush3.bf16.msra.mxu1 %v1040_v63  ;;  %943 = vmatprep.subr.bf16.mxu0 %v1041_v0 }
  0x56   :  { %965 = vmatprep.subr.bf16.mxu1 %v1042_v1 }
  0x58   :  { %944 = vmatpush3.bf16.msra.mxu0 %v1043_v2 }
  0x59   :  { %966 = vmatpush3.bf16.msra.mxu1 %v1044_v3  ;;  %945 = vmatprep.subr.bf16.mxu0 %v1045_v4 }
  0x5a   :  { %967 = vmatprep.subr.bf16.mxu1 %v1046_v5 }
  0x5c   :  { %946 = vmatpush3.bf16.msra.mxu0 %v1047_v6 }
  0x5d   :  { %968 = vmatpush3.bf16.msra.mxu1 %v1048_v7 }
  0x5f   :  { %727 = vmatmul.mubr.bf16.vlgmr.msra.gmra.mxu0 %v818_v10 }
  0x60   :  { %768 = vmatmul.mubr.bf16.vlgmr.msra.gmra.mxu1 %v820_v14 }
  0xff   :  { %v903_v16 = vpop.f32.mrf.mxu0 }
 0x100   :  { %v925_v17 = vpop.f32.mrf.mxu1 }
 0x101   :  { %v904_v18 = vpop.f32.mrf.mxu0 }
 0x102   :  { %v926_v19 = vpop.f32.mrf.mxu1  ;;  %v905_v23 = vadd.f32 %v904_v18, %v903_v16 }
 0x103   :  { %v906_v20 = vpop.f32.mrf.mxu0  ;;  %v927_v24 = vadd.f32 %v926_v19, %v925_v17 }
 0x104   :  { %v928_v21 = vpop.f32.mrf.mxu1 }
 0x105   :  { %v907_v22 = vpop.f32.mrf.mxu0  ;;  %v688_v29 = vadd.f32 %v927_v24, %v905_v23 }
 0x106   :  { %v929_v25 = vpop.f32.mrf.mxu1  ;;  %v908_v30 = vadd.f32 %v907_v22, %v906_v20 }
 0x107   :  { %v930_v31 = vadd.f32 %v929_v25, %v928_v21 }
 0x109   :  { %v691_v39 = vadd.f32 %v930_v31, %v908_v30 }
 0x11f   :  { %v947_v26 = vpop.f32.mrf.mxu0 }
 0x120   :  { %v969_v27 = vpop.f32.mrf.mxu1 }
 0x121   :  { %v948_v28 = vpop.f32.mrf.mxu0 }
 0x122   :  { %v949_v32 = vadd.f32 %v948_v28, %v947_v26  ;;  %v970_v33 = vpop.f32.mrf.mxu1 }
 0x123   :  { %v950_v34 = vpop.f32.mrf.mxu0  ;;  %v971_v36 = vadd.f32 %v970_v33, %v969_v27 }
 0x124   :  { %v729_v35 = vadd.f32 %v949_v32, %v688_v29  ;;  %v972_v37 = vpop.f32.mrf.mxu1 }
 0x125   :  { %v951_v38 = vpop.f32.mrf.mxu0 }
 0x126   :  { %v770_v40 = vadd.f32 %v971_v36, %v729_v35  ;;  %v952_v41 = vadd.f32 %v951_v38, %v950_v34  ;;  %v973_v42 = vpop.f32.mrf.mxu1 }
 0x127   :  { %v974_v45 = vadd.f32 %v973_v42, %v972_v37 }
 0x128   :  { %v732_v44 = vadd.f32 %v952_v41, %v691_v39  ;;  %v792_v47 = vadd.f32 %v886_v43, %v770_v40 }
 0x12a   :  { %v773_v46 = vadd.f32 %v974_v45, %v732_v44  ;;  %794 = vst [vmem:[#allocation7] sm:$0xff] %v792_v47 }
 0x12c   :  { %v793_v48 = vadd.f32 %v886_v43, %v773_v46 }
 0x12e   :  { %795 = vst [vmem:[#allocation7 + $0x8] sm:$0xff] %v793_v48 }
 0x12f   :  { %1100 = shalt.err (!%p1097_p0)
}
 0x130   :  { %s1122_s29 = smov 128   ;;  %s1123_s30 = smov 8  }
 0x131   :  { %807 = dma.vmem_to_hbm [thread:$0]  %s802_s27, 256, %s1159_s3, [#allocation4], %s1122_s29, %s1122_s29, %s1123_s30  }
 0x132   :  { %1113 = dma.done.wait [#allocation4], 256  }
 0x133   :  { %1114 = vsyncadd [#allocation4], 4294967040 }
 0x134   :  { %811 = vsyncpa [#allocation3], 1 }
 0x135   :  { %812 = vsyncpa [#allocation6], 1 }
 0x136   :  { %813 = vsyncpa [#allocation4], 1 }

</bundles_post_ra>
